<compile_context>
chip_gen: v7x
topology: tpu7x:2x2x1
jax: 0.10.0
libtpu: 0.0.40
codegen_flags: <defaults>
</compile_context>

<pallas_src>
import functools

import jax
import jax.numpy as jnp
from jax.experimental import pallas as pl
from jax.experimental.pallas import tpu as pltpu

NUM_CATEGORIES = 26
_ROWS_PER_GROUP = 64                                   # 64 * 26 = 1664 = 13 * 128
_LANE_COLS = _ROWS_PER_GROUP * NUM_CATEGORIES          # 1664 (lane-dense width)
_DEFAULT_TILE_ROWS = 1024                              # reshaped rows per grid step
_VMEM_LIMIT_BYTES = 48 * 1024 * 1024                   # <= v7x 64 MiB, << v5e/v6e 128 MiB
_VMEM_TILE_BUDGET = 36 * 1024 * 1024                   # budget for 2 inputs x 2 buffers

# Static weights from the reference module (weight_type='static').
_STATIC_WEIGHTS = (
    0.1435, 0.187, 0.1692, 0.1165, 0.1949, 0.1204, 0.1728, 0.1372, 0.162,
    0.154, 0.1987, 0.1057, 0.1482, 0.1192, 0.159, 0.1929, 0.1158, 0.1907,
    0.1345, 0.1307, 0.1665, 0.1698, 0.1797, 0.1657, 0.152, 0.1537,
)


def _partials_kernel(pred_ref, target_ref, *out_refs, tile_rows, num_rows):
    """One grid step over a lane-dense (tile_rows, 1664) block.

    Accumulates per-lane-column sums of (pred - target)^2 into out_refs[0] and
    (dynamic weights only) per-lane-column sums of target into out_refs[1].
    Output blocks are VMEM-resident accumulators across the whole grid.
    """
    need_tsum = len(out_refs) == 2
    d2_ref = out_refs[0]
    tsum_ref = out_refs[1] if need_tsum else None

    step = pl.program_id(0)

    @pl.when(step == 0)
    def _init():
        d2_ref[...] = jnp.zeros_like(d2_ref)
        if need_tsum:
            tsum_ref[...] = jnp.zeros_like(tsum_ref)

    # Upcast per tile (bf16 inputs stream at half the HBM bytes; acc stays f32).
    p = pred_ref[...].astype(jnp.float32)
    t = target_ref[...].astype(jnp.float32)
    d2 = (p - t) * (p - t)

    ragged = (num_rows % tile_rows) != 0   # static

    if not ragged:
        d2_ref[...] += jnp.sum(d2, axis=0, keepdims=True)
        if need_tsum:
            tsum_ref[...] += jnp.sum(t, axis=0, keepdims=True)
    else:
        last = pl.num_programs(0) - 1

        @pl.when(step != last)
        def _full():
            d2_ref[...] += jnp.sum(d2, axis=0, keepdims=True)
            if need_tsum:
                tsum_ref[...] += jnp.sum(t, axis=0, keepdims=True)

        @pl.when(step == last)
        def _masked():
            # Mask only on the final step; scalar row limit vs. local iota.
            valid_rows = num_rows - step * tile_rows
            row = jax.lax.broadcasted_iota(jnp.int32, d2.shape, 0)
            valid = row < valid_rows
            # Keep select-style masking (NOT multiplicative): padded rows may
            # hold garbage/NaN and 0*NaN would poison the sum.
            d2_ref[...] += jnp.sum(jnp.where(valid, d2, 0.0), axis=0, keepdims=True)
            if need_tsum:
                tsum_ref[...] += jnp.sum(jnp.where(valid, t, 0.0), axis=0, keepdims=True)


def _fold_lanes(colsum_row):
    """(1, 1664) lane-dense column sums -> (26,) per-category sums.

    Lane l of the reshaped layout corresponds to original category l % 26
    (row-invariant because 1664 % 26 == 0), so folding is a (64, 26).sum(0).
    """
    return jnp.sum(colsum_row.reshape(_ROWS_PER_GROUP, NUM_CATEGORIES), axis=0)


@functools.partial(jax.jit, static_argnames=("weight_type", "tile_rows"))
def discrete_loss(pred, target, weight_type="mean", tile_rows=None):
    """Pallas implementation of DiscreteLoss.forward.

    pred, target: arrays of shape (N, 26) (f32 or bf16).
    Returns a float32 scalar: sum((pred - target)^2 * weights).
    """
    n, c = pred.shape
    if c != NUM_CATEGORIES:
        raise ValueError(f"DiscreteLoss expects {NUM_CATEGORIES} categories, got {c}")
    if weight_type not in ("mean", "static", "dynamic"):
        raise ValueError(f"unknown weight_type: {weight_type}")

    need_tsum = weight_type == "dynamic"
    m = n // _ROWS_PER_GROUP                 # full lane-dense groups of 64 rows
    tail = n - m * _ROWS_PER_GROUP

    d2_per_cat = jnp.zeros((NUM_CATEGORIES,), jnp.float32)
    tgt_per_cat = jnp.zeros((NUM_CATEGORIES,), jnp.float32)

    if m > 0:
        # Free row-major reshape to the lane-dense view (N//64, 1664).
        pred_r = pred[: m * _ROWS_PER_GROUP].reshape(m, _LANE_COLS)
        tgt_r = target[: m * _ROWS_PER_GROUP].reshape(m, _LANE_COLS)

        itemsize = max(pred_r.dtype.itemsize, tgt_r.dtype.itemsize)
        # bf16 (and other sub-32-bit) VMEM tiling is (16, 128): force rows % 16.
        sub = 16 if min(pred_r.dtype.itemsize, tgt_r.dtype.itemsize) < 4 else 8

        tr = _DEFAULT_TILE_ROWS if tile_rows is None else tile_rows
        # Cap so 2 inputs x 2 pipeline buffers of the raw-dtype tile fit budget.
        max_tr = max(sub, (_VMEM_TILE_BUDGET // (4 * _LANE_COLS * itemsize)) // sub * sub)
        tr = min(tr, max_tr)
        if tr >= m:
            tr = m                           # single block spanning all rows
        else:
            tr = max(sub, (tr // sub) * sub)
            if tr >= m:
                tr = m

        grid = (pl.cdiv(m, tr),)

        out_shapes = [jax.ShapeDtypeStruct((1, _LANE_COLS), jnp.float32)]
        out_specs = [pl.BlockSpec((1, _LANE_COLS), lambda i: (0, 0))]
        if need_tsum:
            out_shapes.append(jax.ShapeDtypeStruct((1, _LANE_COLS), jnp.float32))
            out_specs.append(pl.BlockSpec((1, _LANE_COLS), lambda i: (0, 0)))

        kernel = functools.partial(_partials_kernel, tile_rows=tr, num_rows=m)

        bytes_accessed = (m * _LANE_COLS * (pred_r.dtype.itemsize + tgt_r.dtype.itemsize)
                          + len(out_shapes) * _LANE_COLS * 4)
        flops = (4 if need_tsum else 3) * m * _LANE_COLS
        cost = pl.CostEstimate(flops=flops, transcendentals=0,
                               bytes_accessed=bytes_accessed)

        outs = pl.pallas_call(
            kernel,
            out_shape=tuple(out_shapes),
            grid_spec=pltpu.PrefetchScalarGridSpec(
                num_scalar_prefetch=0,
                grid=grid,
                in_specs=[
                    pl.BlockSpec((tr, _LANE_COLS), lambda i: (i, 0)),
                    pl.BlockSpec((tr, _LANE_COLS), lambda i: (i, 0)),
                ],
                out_specs=tuple(out_specs),
            ),
            compiler_params=pltpu.CompilerParams(
                dimension_semantics=("arbitrary",),
                vmem_limit_bytes=_VMEM_LIMIT_BYTES),
            cost_estimate=cost,
        )(pred_r, tgt_r)

        if need_tsum:
            d2_colsum, tgt_colsum = outs
            tgt_per_cat = tgt_per_cat + _fold_lanes(tgt_colsum)
        else:
            (d2_colsum,) = outs
        d2_per_cat = d2_per_cat + _fold_lanes(d2_colsum)

    if tail > 0:
        # <= 63 leftover rows: negligible work, keep the kernel lane-dense.
        tp = pred[m * _ROWS_PER_GROUP:].astype(jnp.float32)
        tt = target[m * _ROWS_PER_GROUP:].astype(jnp.float32)
        d2_per_cat = d2_per_cat + jnp.sum((tp - tt) ** 2, axis=0)
        if need_tsum:
            tgt_per_cat = tgt_per_cat + jnp.sum(tt, axis=0)

    # ---- O(26) finalize: weights applied to per-category sums ------------
    if weight_type == "mean":
        return jnp.sum(d2_per_cat) * jnp.float32(1.0 / NUM_CATEGORIES)
    if weight_type == "static":
        return jnp.sum(d2_per_cat * jnp.array(_STATIC_WEIGHTS, jnp.float32))
    # dynamic: mirrors prepare_dynamic_weights on the fused target column sums.
    w = jnp.where(tgt_per_cat != 0,
                  1.0 / jnp.log(tgt_per_cat + 1.2),
                  jnp.float32(0.0001))
    return jnp.sum(d2_per_cat * w)


def _reference_loss(pred, target, weight_type):
    pred = pred.astype(jnp.float32)
    target = target.astype(jnp.float32)
    if weight_type == "mean":
        w = jnp.ones((1, NUM_CATEGORIES), jnp.float32) / NUM_CATEGORIES
    elif weight_type == "static":
        w = jnp.array([_STATIC_WEIGHTS], jnp.float32)
    else:
        ts = jnp.sum(target, axis=0, keepdims=True)
        w = jnp.where(ts != 0, 1.0 / jnp.log(ts + 1.2), jnp.float32(0.0001))
    return jnp.sum((pred - target) ** 2 * w)


if __name__ == "__main__":
    key = jax.random.PRNGKey(0)
    k1, k2, k3, k4, k5, k6 = jax.random.split(key, 6)

    ok = True

    def check(tag, got, want, rtol=1e-4, atol=1e-4):
        global ok
        if not jnp.allclose(got, want, rtol=rtol, atol=atol):
            ok = False
            print(f"MISMATCH ({tag}): got {got}, want {want}")

    # Case 1: N multiple of 64, single-block kernel path (no tail, no mask).
    n1 = 256
    pred1 = jax.random.uniform(k1, (n1, NUM_CATEGORIES), jnp.float32)
    target1 = (jax.random.uniform(k2, (n1, NUM_CATEGORIES), jnp.float32) > 0.7
               ).astype(jnp.float32)
    for wt in ("mean", "static", "dynamic"):
        got = jax.block_until_ready(discrete_loss(pred1, target1, weight_type=wt))
        check(f"{wt}, n={n1}", got, _reference_loss(pred1, target1, wt))

    # Case 2: multi-step grid with a ragged (masked) last tile AND a <64-row
    # tail handled in the wrapper (n = 64*20 + 37, tile_rows=8 -> 3 steps).
    n2 = 64 * 20 + 37
    pred2 = jax.random.uniform(k3, (n2, NUM_CATEGORIES), jnp.float32)
    target2 = (jax.random.uniform(k4, (n2, NUM_CATEGORIES), jnp.float32) > 0.7
               ).astype(jnp.float32)
    for wt in ("mean", "static", "dynamic"):
        got = jax.block_until_ready(
            discrete_loss(pred2, target2, weight_type=wt, tile_rows=8))
        check(f"{wt}, n={n2} tiled", got, _reference_loss(pred2, target2, wt))

    # Case 3: bf16 inputs (in-kernel upcast, 16-sublane tile), ragged grid.
    n3 = 64 * 40
    pred3 = jax.random.uniform(k5, (n3, NUM_CATEGORIES), jnp.float32
                               ).astype(jnp.bfloat16)
    target3 = (jax.random.uniform(k6, (n3, NUM_CATEGORIES), jnp.float32) > 0.7
               ).astype(jnp.bfloat16)
    for wt in ("mean", "static", "dynamic"):
        got = jax.block_until_ready(
            discrete_loss(pred3, target3, weight_type=wt, tile_rows=16))
        check(f"{wt}, n={n3} bf16", got, _reference_loss(pred3, target3, wt),
              rtol=5e-3, atol=5e-3)

    if ok:
        print("KERNEL_OK")
</pallas_src>

<mosaic_0001>
module attributes {stable_mosaic.version = 11 : i64} {
  func.func @_partials_kernel(%arg0: i32, %arg1: memref<4x1664xf32, #tpu.memory_space<vmem>>, %arg2: memref<4x1664xf32, #tpu.memory_space<vmem>>, %arg3: memref<1x1664xf32, #tpu.memory_space<vmem>>) attributes {dimension_semantics = [#tpu.dimension_semantics<arbitrary>], iteration_bounds = array<i64: 1>, scalar_prefetch = 0 : i64, scratch_operands = 0 : i64, tpu.core_type = #tpu.core_type<tc>, window_params = [{transform_indices = @transform_0, window_bounds = array<i64: 4, 1664>}, {transform_indices = @transform_1, window_bounds = array<i64: 4, 1664>}, {pipeline_mode = #tpu.pipeline_mode<synchronous>, transform_indices = @transform_2, window_bounds = array<i64: 1, 1664>}]} {
    %c0_i32 = arith.constant 0 : i32
    %0 = arith.cmpi eq, %arg0, %c0_i32 : i32
    %1 = arith.extui %0 : i1 to i32
    %c0_i32_0 = arith.constant 0 : i32
    %2 = arith.cmpi ne, %1, %c0_i32_0 : i32
    scf.if %2 {
      %cst_8 = arith.constant 0.000000e+00 : f32
      %13 = vector.broadcast %cst_8 : f32 to vector<1x1664xf32>
      %c0_9 = arith.constant 0 : index
      %c0_10 = arith.constant 0 : index
      %14 = vector.load %arg3[%c0_9, %c0_10] : memref<1x1664xf32, #tpu.memory_space<vmem>>, vector<1x1664xf32>
      tpu.vector_store %arg3[%c0_9, %c0_10], %13 {strides = array<i32>} : memref<1x1664xf32, #tpu.memory_space<vmem>>, vector<1x1664xf32>,
    } else {
    }
    %c0 = arith.constant 0 : index
    %c0_1 = arith.constant 0 : index
    %3 = vector.load %arg1[%c0, %c0_1] : memref<4x1664xf32, #tpu.memory_space<vmem>>, vector<4x1664xf32>
    %c0_2 = arith.constant 0 : index
    %c0_3 = arith.constant 0 : index
    %4 = vector.load %arg2[%c0_2, %c0_3] : memref<4x1664xf32, #tpu.memory_space<vmem>>, vector<4x1664xf32>
    %5 = arith.subf %3, %4 : vector<4x1664xf32>
    %6 = arith.subf %3, %4 : vector<4x1664xf32>
    %7 = arith.mulf %5, %6 : vector<4x1664xf32>
    %c0_4 = arith.constant 0 : index
    %c0_5 = arith.constant 0 : index
    %8 = vector.load %arg3[%c0_4, %c0_5] : memref<1x1664xf32, #tpu.memory_space<vmem>>, vector<1x1664xf32>
    %cst = arith.constant dense<0.000000e+00> : vector<1664xf32>
    %9 = vector.multi_reduction <add>, %7, %cst [0] : vector<4x1664xf32> to vector<1664xf32>
    %10 = vector.shape_cast %9 : vector<1664xf32> to vector<1x1664xf32>
    %11 = arith.addf %8, %10 : vector<1x1664xf32>
    %c0_6 = arith.constant 0 : index
    %c0_7 = arith.constant 0 : index
    %12 = vector.load %arg3[%c0_6, %c0_7] : memref<1x1664xf32, #tpu.memory_space<vmem>>, vector<1x1664xf32>
    tpu.vector_store %arg3[%c0_6, %c0_7], %11 {strides = array<i32>} : memref<1x1664xf32, #tpu.memory_space<vmem>>, vector<1x1664xf32>,
    return
  }
  func.func @transform_0(%arg0: i32) -> (i32, i32) {
    %c0_i32 = arith.constant 0 : i32
    %c0_i32_0 = arith.constant 0 : i32
    return %arg0, %c0_i32 : i32, i32
  }
  func.func @transform_1(%arg0: i32) -> (i32, i32) {
    %c0_i32 = arith.constant 0 : i32
    %c0_i32_0 = arith.constant 0 : i32
    return %arg0, %c0_i32 : i32, i32
  }
  func.func @transform_2(%arg0: i32) -> (i32, i32) {
    %c0_i32 = arith.constant 0 : i32
    %c0_i32_0 = arith.constant 0 : i32
    %c0_i32_1 = arith.constant 0 : i32
    return %c0_i32, %c0_i32_0 : i32, i32
  }
}

</mosaic_0001>

<bundles_post_ra>
// kernel: discrete_loss.1
= control target key start
LH: loop header
LB: loop body
LE: loop exit
PB: predicated region body
PF: predicated region fallthrough
CT: control target
= control target key end

     0   :  { %v16_v0 = vlaneseq  ;;  %v278_v1 = vmov 1966171168   ;;  %v279_v11 = vmov 0.0   ;;  %vm69_vm1 = vcmask 1043456   ;;  %s387_s2 = inlined_call_operand.vmem [shape: f32[1,1664], index: 2, kind: output, shape index: {}]   ;;  %s388_s0 = inlined_call_operand.vmem [shape: f32[4,1664], index: 0, kind: input, shape index: {}]   ;;  %s389_s1 = inlined_call_operand.vmem [shape: f32[4,1664], index: 1, kind: input, shape index: {}]  }
   0x1   :  { %v179_v2 = vunpack.c.l.s4 %v278_v1  ;;  %v21_v3 = vld [vmem:[%s388_s0] sm:$0xff]  ;;  %v22_v4 = vld [vmem:[%s388_s0 + $0x8] sm:$0xff]  ;;  %v23_v5 = vld [vmem:[%s388_s0 + $0x10] sm:$0xff] }
   0x2   :  { %vm304_vm0 = vcmp.lt.s32.totalorder %v16_v0, 640  ;;  %v182_v7 = vshrl.u32 %v16_v0, 7  ;;  %v24_v8 = vld [vmem:[%s388_s0 + $0x18] sm:$0xff]  ;;  %v28_v9 = vld [vmem:[%s389_s1] sm:$0xff]  ;;  %v29_v10 = vld [vmem:[%s389_s1 + $0x8] sm:$0xff] }
   0x3   :  { %20 = vst.msk [vmem:[%s387_s2 + $0x8] sm:$0x1f] %vm304_vm0, %v279_v11  ;;  %v180_v12 = vunpack.c.0.s8 %v179_v2  ;;  %v30_v13 = vld [vmem:[%s389_s1 + $0x10] sm:$0xff]  ;;  %v31_v14 = vld [vmem:[%s389_s1 + $0x18] sm:$0xff]  ;;  %v35_v15 = vsub.f32 %v21_v3, %v28_v9  ;;  %v36_v16 = vsub.f32 %v22_v4, %v29_v10  ;;  %v25_v17 = vld [vmem:[%s388_s0 + $0x20] sm:$0xff] }
   0x4   :  { %v37_v18 = vsub.f32 %v23_v5, %v30_v13  ;;  %v38_v19 = vsub.f32 %v24_v8, %v31_v14  ;;  %v26_v20 = vld [vmem:[%s388_s0 + $0x28] sm:$0xff]  ;;  %v27_v21 = vld [vmem:[%s388_s0 + $0x30] sm:$0xf]  ;;  %v32_v22 = vld [vmem:[%s389_s1 + $0x20] sm:$0xff] }
   0x5   :  { %v340_v23 = vsub.s32 %v180_v12, %v182_v7  ;;  %v42_v24 = vmul.f32 %v35_v15, %v35_v15  ;;  %v43_v25 = vmul.f32 %v36_v16, %v36_v16  ;;  %v33_v26 = vld [vmem:[%s389_s1 + $0x28] sm:$0xff]  ;;  %v34_v27 = vld [vmem:[%s389_s1 + $0x30] sm:$0xf]  ;;  %v39_v28 = vsub.f32 %v25_v17, %v32_v22 }
   0x6   :  { %v44_v29 = vmul.f32 %v37_v18, %v37_v18  ;;  %v45_v30 = vmul.f32 %v38_v19, %v38_v19  ;;  %v40_v31 = vsub.f32 %v26_v20, %v33_v26  ;;  %v348_v32 = vsub.f32 %v27_v21, %v34_v27 }
   0x7   :  { %v57_v33 = vcombine.high %v42_v24, %v42_v24  ;;  %v58_v34 = vcombine.high %v43_v25, %v43_v25  ;;  %v70_v35 = vsel %vm69_vm1, %v42_v24, 0.0  ;;  %v84_v36 = vsel %vm69_vm1, %v43_v25, 0.0 }
   0x8   :  { %v59_v37 = vcombine.high %v44_v29, %v44_v29  ;;  %v60_v38 = vcombine.high %v45_v30, %v45_v30  ;;  %v71_v39 = vrot.slane %v70_v35, 4  ;;  %v85_v40 = vrot.slane %v84_v36, 4 }
   0x9   :  { %v77_v41 = vsel %vm69_vm1, %v57_v33, 0.0  ;;  %v91_v42 = vsel %vm69_vm1, %v58_v34, 0.0  ;;  %v98_v43 = vsel %vm69_vm1, %v44_v29, 0.0  ;;  %v112_v44 = vsel %vm69_vm1, %v45_v30, 0.0 }
   0xa   :  { %v72_v45 = vadd.f32 %v71_v39, %v70_v35  ;;  %v78_v46 = vrot.slane %v77_v41, 4  ;;  %v86_v47 = vadd.f32 %v85_v40, %v84_v36  ;;  %v92_v48 = vrot.slane %v91_v42, 4 }
   0xb   :  { %v99_v49 = vrot.slane %v98_v43, 4  ;;  %v105_v50 = vsel %vm69_vm1, %v59_v37, 0.0  ;;  %v113_v51 = vrot.slane %v112_v44, 4  ;;  %v119_v52 = vsel %vm69_vm1, %v60_v38, 0.0 }
   0xc   :  { %v73_v53 = vrot.slane %v72_v45, 2  ;;  %v79_v54 = vadd.f32 %v78_v46, %v77_v41  ;;  %v87_v55 = vrot.slane %v86_v47, 2  ;;  %v93_v56 = vadd.f32 %v92_v48, %v91_v42 }
   0xd   :  { %v100_v57 = vadd.f32 %v99_v49, %v98_v43  ;;  %v106_v58 = vrot.slane %v105_v50, 4  ;;  %v114_v59 = vadd.f32 %v113_v51, %v112_v44  ;;  %v120_v60 = vrot.slane %v119_v52, 4 }
   0xe   :  { %v74_v61 = vadd.f32 %v73_v53, %v72_v45  ;;  %v80_v62 = vrot.slane %v79_v54, 2  ;;  %v88_v63 = vadd.f32 %v87_v55, %v86_v47  ;;  %v94_v0 = vrot.slane %v93_v56, 2 }
   0xf   :  { %v101_v1 = vrot.slane %v100_v57, 2  ;;  %v107_v2 = vadd.f32 %v106_v58, %v105_v50  ;;  %v115_v3 = vrot.slane %v114_v59, 2  ;;  %v121_v4 = vadd.f32 %v120_v60, %v119_v52 }
  0x10   :  { %v75_v5 = vrot.slane %v74_v61, 1  ;;  %v81_v7 = vadd.f32 %v80_v62, %v79_v54  ;;  %v89_v8 = vrot.slane %v88_v63, 1  ;;  %v95_v9 = vadd.f32 %v94_v0, %v93_v56 }
  0x11   :  { %v102_v10 = vadd.f32 %v101_v1, %v100_v57  ;;  %v108_v11 = vrot.slane %v107_v2, 2  ;;  %v116_v12 = vadd.f32 %v115_v3, %v114_v59  ;;  %v122_v13 = vrot.slane %v121_v4, 2 }
  0x12   :  { %v76_v14 = vadd.f32 %v75_v5, %v74_v61  ;;  %v82_v15 = vrot.slane %v81_v7, 1  ;;  %v90_v16 = vadd.f32 %v89_v8, %v88_v63  ;;  %v96_v17 = vrot.slane %v95_v9, 1 }
  0x13   :  { %v103_v18 = vrot.slane %v102_v10, 1  ;;  %v109_v19 = vadd.f32 %v108_v11, %v107_v2  ;;  %v117_v20 = vrot.slane %v116_v12, 1  ;;  %v123_v21 = vadd.f32 %v122_v13, %v121_v4 }
  0x14   :  { %v83_v22 = vadd.f32 %v82_v15, %v81_v7  ;;  %v97_v24 = vadd.f32 %v96_v17, %v95_v9  ;;  %v46_v25 = vmul.f32 %v39_v28, %v39_v28  ;;  %v47_v26 = vmul.f32 %v40_v31, %v40_v31 }
  0x15   :  { %v104_v27 = vadd.f32 %v103_v18, %v102_v10  ;;  %v110_v29 = vrot.slane %v109_v19, 1  ;;  %v118_v30 = vadd.f32 %v117_v20, %v116_v12  ;;  %v124_v33 = vrot.slane %v123_v21, 1 }
  0x16   :  { %v174_v34 = vcombine.low %v76_v14, %v83_v22  ;;  %v175_v35 = vcombine.low %v90_v16, %v97_v24  ;;  %v48_v36 = vmul.f32 %v348_v32, %v348_v32  ;;  %v61_v37 = vcombine.high %v46_v25, %v46_v25 }
  0x17   :  { %v111_v38 = vadd.f32 %v110_v29, %v109_v19  ;;  %v125_v39 = vadd.f32 %v124_v33, %v123_v21  ;;  %v62_v40 = vcombine.high %v47_v26, %v47_v26  ;;  %v126_v41 = vsel %vm69_vm1, %v46_v25, 0.0  ;;  %v50_v33 = vld [vmem:[%s387_s2 + $0x8] sm:$0x1f] }
  0x18   :  { %v184_v42 = vrot.slane %v174_v34, %v340_v23  ;;  %v191_v28 = vrot.slane %v175_v35, %v340_v23  ;;  %v127_v31 = vrot.slane %v126_v41, 4  ;;  %v133_v43 = vsel %vm69_vm1, %v61_v37, 0.0 }
  0x19   :  { %v176_v44 = vcombine.low %v104_v27, %v111_v38  ;;  %v177_v45 = vcombine.low %v118_v30, %v125_v39  ;;  %v134_v46 = vrot.slane %v133_v43, 4  ;;  %v140_v47 = vsel %vm69_vm1, %v47_v26, 0.0 }
  0x1a   :  { %v206_v48 = vcombine.low %v184_v42, %v191_v28  ;;  %v128_v32 = vadd.f32 %v127_v31, %v126_v41  ;;  %v141_v49 = vrot.slane %v140_v47, 4  ;;  %v147_v50 = vsel %vm69_vm1, %v62_v40, 0.0 }
  0x1b   :  { %v198_v51 = vrot.slane %v176_v44, %v340_v23  ;;  %v205_v52 = vrot.slane %v177_v45, %v340_v23  ;;  %v135_v53 = vadd.f32 %v134_v46, %v133_v43  ;;  %v148_v54 = vrot.slane %v147_v50, 4 }
  0x1c   :  { %v214_v55 = vrot.slane %v206_v48, %v340_v23  ;;  %v129_v56 = vrot.slane %v128_v32, 2  ;;  %v142_v57 = vadd.f32 %v141_v49, %v140_v47  ;;  %v154_v58 = vsel %vm69_vm1, %v48_v36, 0.0 }
  0x1d   :  { %v207_v59 = vcombine.low %v198_v51, %v205_v52  ;;  %v136_v60 = vrot.slane %v135_v53, 2  ;;  %v149_v61 = vadd.f32 %v148_v54, %v147_v50  ;;  %v155_v62 = vrot.slane %v154_v58, 4 }
  0x1e   :  { %v130_v63 = vadd.f32 %v129_v56, %v128_v32  ;;  %v143_v0 = vrot.slane %v142_v57, 2 }
  0x1f   :  { %v221_v1 = vrot.slane %v207_v59, %v340_v23  ;;  %v137_v2 = vadd.f32 %v136_v60, %v135_v53  ;;  %v150_v3 = vrot.slane %v149_v61, 2  ;;  %v156_v4 = vadd.f32 %v155_v62, %v154_v58 }
  0x20   :  { %v131_v5 = vrot.slane %v130_v63, 1  ;;  %v144_v7 = vadd.f32 %v143_v0, %v142_v57 }
  0x21   :  { %v222_v8 = vcombine.low %v214_v55, %v221_v1  ;;  %v138_v9 = vrot.slane %v137_v2, 1  ;;  %v151_v10 = vadd.f32 %v150_v3, %v149_v61  ;;  %v157_v11 = vrot.slane %v156_v4, 2 }
  0x22   :  { %v132_v12 = vadd.f32 %v131_v5, %v130_v63  ;;  %v145_v13 = vrot.slane %v144_v7, 1 }
  0x23   :  { %v139_v14 = vadd.f32 %v138_v9, %v137_v2  ;;  %v152_v15 = vrot.slane %v151_v10, 1  ;;  %v158_v16 = vadd.f32 %v157_v11, %v156_v4  ;;  %266 = vst [vmem:[%s387_s2] sm:$0xff] %v222_v8 }
  0x24   :  { %v146_v17 = vadd.f32 %v145_v13, %v144_v7 }
  0x25   :  { %v153_v18 = vadd.f32 %v152_v15, %v151_v10  ;;  %v159_v19 = vrot.slane %v158_v16, 1  ;;  %v223_v20 = vcombine.low %v132_v12, %v139_v14 }
  0x27   :  { %v160_v21 = vadd.f32 %v159_v19, %v158_v16  ;;  %v224_v22 = vcombine.low %v146_v17, %v153_v18  ;;  %v231_v24 = vrot.slane %v223_v20, %v340_v23 }
  0x29   :  { %v238_v25 = vrot.slane %v224_v22, %v340_v23  ;;  %v245_v26 = vrot.slane %v160_v21, %v340_v23 }
  0x2b   :  { %v246_v27 = vcombine.low %v231_v24, %v238_v25  ;;  %v260_v29 = vrot.slane %v245_v26, %v340_v23 }
  0x2d   :  { %v253_v30 = vrot.slane %v246_v27, %v340_v23 }
  0x2f   :  { %v261_v34 = vcombine.low %v253_v30, %v260_v29 }
  0x31   :  { %v265_v35 = vadd.f32 %v261_v34, %v50_v33 }
  0x33   :  { %271 = vst.msk [vmem:[%s387_s2 + $0x8] sm:$0x1f] %vm304_vm0, %v265_v35 }

</bundles_post_ra>
